<compile_context>
chip_gen: v6e
topology: v6e:2x2x1
jax: 0.10.0
libtpu: 0.0.40
codegen_flags: <defaults>
</compile_context>

<pallas_src>
import functools

import jax
import jax.numpy as jnp
from jax.experimental import pallas as pl
from jax.experimental.pallas import tpu as pltpu


def _round_up(x, m):
    return ((x + m - 1) // m) * m


def _mxu_dtype(precision):
    if precision == "bf16":
        return jnp.bfloat16
    if precision == "f32":
        return jnp.float32
    raise ValueError(f"unknown precision: {precision!r}")


def _default_group():
    """Row-packing factor g so the packed hidden width g*32 matches the MXU."""
    try:
        kind = jax.devices()[0].device_kind.lower()
    except Exception:
        return 8
    # 128-wide MXU generations (v2-v5) -> g=4; 256-wide MXU (v6e/v7x) -> g=8.
    if any(tag in kind for tag in ("v2", "v3", "v4", "v5")):
        return 4
    return 8


def _block_diag(w, g):
    """(fi, fo) -> (g*fi, g*fo) block-diagonal with `w` on the diagonal blocks."""
    fi, fo = w.shape
    eye = jnp.eye(g, dtype=w.dtype)
    bd = eye[:, None, :, None] * w[None, :, None, :]      # (g, fi, g, fo)
    return bd.reshape(g * fi, g * fo)


def pack_params(params, *, group, precision="bf16"):
    """Build packed (block-diagonal) weights + tiled biases once.

    Call this at init time and pass the result via `packed=` to avoid paying
    the packing ops on every forward call.
    """
    w1, b1, w2, b2, w3, b3 = params
    wd = _mxu_dtype(precision)
    w1p = _block_diag(w1, group).astype(wd)
    w2p = _block_diag(w2, group).astype(wd)
    w3p = _block_diag(w3, group).astype(wd)
    b1p = jnp.tile(b1.astype(jnp.float32), (1, group))
    b2p = jnp.tile(b2.astype(jnp.float32), (1, group))
    b3p = jnp.tile(b3.astype(jnp.float32), (1, group))
    return (w1p, b1p, w2p, b2p, w3p, b3p)


def _relational_mlp_kernel(x_ref, w1_ref, b1_ref, w2_ref, b2_ref,
                           w3_ref, b3_ref, o_ref, *, chunk_g):
    """relu(relu(x@W1+b1)@W2+b2)@W3+b3 over one packed row tile.

    The tile is processed in chunk_g-row chunks (static, unrolled) so the
    (chunk, g*hid) intermediates stay in vregs; the MXU sees bf16 inputs with
    f32 accumulation.
    """
    mxu_dtype = w1_ref.dtype
    rows_blk = x_ref.shape[0]

    def one_chunk(r0, n):
        x = x_ref[pl.ds(r0, n), :].astype(mxu_dtype)
        h1 = jnp.dot(x, w1_ref[...], preferred_element_type=jnp.float32)
        h1 = jnp.maximum(h1 + b1_ref[...], 0.0).astype(mxu_dtype)
        h2 = jnp.dot(h1, w2_ref[...], preferred_element_type=jnp.float32)
        h2 = jnp.maximum(h2 + b2_ref[...], 0.0).astype(mxu_dtype)
        out = jnp.dot(h2, w3_ref[...], preferred_element_type=jnp.float32)
        o_ref[pl.ds(r0, n), :] = (out + b3_ref[...]).astype(o_ref.dtype)

    n_full = rows_blk // chunk_g
    rem = rows_blk - n_full * chunk_g
    for c in range(n_full):                # static starts -> zero-cost ref views
        one_chunk(c * chunk_g, chunk_g)
    if rem:
        one_chunk(n_full * chunk_g, rem)
    # TODO(synk): output block is only g*out (<=32) lanes wide; if vst ever
    # saturates, regroup 4 packed rows into a 128-lane output slab.


_MIN_GRID_STEPS = 8   # >= 4 steps per TensorCore keeps the pipeline fed on v7x


def _tile_groups(groups, tile_m, g, chunk_g):
    """Packed-row tile size: big for DMA amortization, but >= _MIN_GRID_STEPS
    grid steps when there is enough work, and a multiple of chunk_g."""
    if groups <= chunk_g:
        return groups                                   # single full-extent block
    tile_g = max(chunk_g, (_round_up(tile_m, g) // g) // chunk_g * chunk_g)
    if groups >= _MIN_GRID_STEPS * chunk_g:
        cap = _round_up(pl.cdiv(groups, _MIN_GRID_STEPS), chunk_g)
        tile_g = min(tile_g, cap)
    if tile_g >= groups:
        return groups
    return tile_g


@functools.partial(jax.jit, static_argnames=("tile_m", "group", "chunk_g"))
def _relational_model_packed(m, params, packed, *, tile_m, group, chunk_g):
    w1, b1, w2, b2, w3, b3 = params
    w1p, b1p, w2p, b2p, w3p, b3p = packed
    in_size, hid_size = w1.shape
    out_size = w3.shape[1]
    g = group

    orig_shape = m.shape
    x = m.reshape(-1, in_size)
    rows = x.shape[0]

    def dense_tail(xt):          # plain-JAX path for the < g leftover rows
        h = jax.nn.relu(xt @ w1 + b1[0])
        h = jax.nn.relu(h @ w2 + b2[0])
        return (h @ w3 + b3[0]).astype(m.dtype)

    if rows == 0:
        return jnp.zeros(orig_shape[:-1] + (out_size,), m.dtype)

    rows_main = (rows // g) * g
    leftover = rows - rows_main

    if rows_main == 0:           # fewer than g rows total
        return dense_tail(x).reshape(orig_shape[:-1] + (out_size,))

    groups = rows_main // g
    # Free row-major view: no jnp.pad copy of the full input.
    xp = x[:rows_main].reshape(groups, g * in_size)

    tile_g = _tile_groups(groups, tile_m, g, chunk_g)
    grid = (pl.cdiv(groups, tile_g),)

    itemsize = jnp.dtype(m.dtype).itemsize
    # Logical FLOPs (the MXU executes the padded block-diagonal shapes; this
    # is only a scheduling hint for XLA).
    flops = 2 * rows_main * (in_size * hid_size + hid_size * hid_size
                             + hid_size * out_size)
    bytes_accessed = (rows_main * (in_size + out_size) * itemsize
                      + sum(int(a.size) * a.dtype.itemsize for a in packed))
    cost = pl.CostEstimate(flops=flops, transcendentals=0,
                           bytes_accessed=bytes_accessed)

    kernel = functools.partial(_relational_mlp_kernel, chunk_g=chunk_g)

    out_p = pl.pallas_call(
        kernel,
        out_shape=jax.ShapeDtypeStruct((groups, g * out_size), m.dtype),
        grid_spec=pltpu.PrefetchScalarGridSpec(
            num_scalar_prefetch=0,
            grid=grid,
            in_specs=[
                pl.BlockSpec((tile_g, g * in_size), lambda i: (i, 0)),         # x
                pl.BlockSpec((g * in_size, g * hid_size), lambda i: (0, 0)),   # W1
                pl.BlockSpec((1, g * hid_size), lambda i: (0, 0)),             # b1
                pl.BlockSpec((g * hid_size, g * hid_size), lambda i: (0, 0)),  # W2
                pl.BlockSpec((1, g * hid_size), lambda i: (0, 0)),             # b2
                pl.BlockSpec((g * hid_size, g * out_size), lambda i: (0, 0)),  # W3
                pl.BlockSpec((1, g * out_size), lambda i: (0, 0)),             # b3
            ],
            out_specs=pl.BlockSpec((tile_g, g * out_size), lambda i: (i, 0)),
        ),
        compiler_params=pltpu.CompilerParams(
            dimension_semantics=("parallel",)),
        cost_estimate=cost,
    )(xp, w1p, b1p, w2p, b2p, w3p, b3p)

    out = out_p.reshape(rows_main, out_size)
    if leftover:
        out = jnp.concatenate([out, dense_tail(x[rows_main:])], axis=0)
    return out.reshape(orig_shape[:-1] + (out_size,))


def relational_model(m, params, *, packed=None, tile_m=8192, group=None,
                     precision="bf16", chunk_g=64):
    """Apply the RelationalModel MLP to `m` of shape [..., input_size]."""
    g = _default_group() if group is None else group
    if packed is None:
        packed = pack_params(params, group=g, precision=precision)
    return _relational_model_packed(m, params, packed,
                                    tile_m=tile_m, group=g, chunk_g=chunk_g)


def init_params(key, input_size, output_size, hidden_size, dtype=jnp.float32):
    """Init mirroring nn.Linear default (uniform +/- 1/sqrt(fan_in)), W stored [in, out]."""
    keys = jax.random.split(key, 6)

    def linear(kw, kb, fan_in, fan_out):
        bound = 1.0 / jnp.sqrt(jnp.asarray(fan_in, dtype))
        w = jax.random.uniform(kw, (fan_in, fan_out), dtype, -bound, bound)
        b = jax.random.uniform(kb, (1, fan_out), dtype, -bound, bound)
        return w, b

    w1, b1 = linear(keys[0], keys[1], input_size, hidden_size)
    w2, b2 = linear(keys[2], keys[3], hidden_size, hidden_size)
    w3, b3 = linear(keys[4], keys[5], hidden_size, output_size)
    return (w1, b1, w2, b2, w3, b3)


def _reference(m, params):
    w1, b1, w2, b2, w3, b3 = params
    h = jax.nn.relu(m @ w1 + b1[0])
    h = jax.nn.relu(h @ w2 + b2[0])
    return h @ w3 + b3[0]


if __name__ == "__main__":
    # RelationalModel(input_size=6, output_size=4, hidden_size=32)
    input_size, output_size, hidden_size = 6, 4, 32
    n_edges = 200  # rows (number of edges in the interaction graph)

    key = jax.random.PRNGKey(0)
    k_params, k_data = jax.random.split(key)

    params = init_params(k_params, input_size, output_size, hidden_size)
    m = jax.random.normal(k_data, (n_edges, input_size), dtype=jnp.float32)
    ref = _reference(m, params)

    # 1) Exact f32 path: proves the block-diagonal lane packing is exact.
    out_f32 = jax.block_until_ready(relational_model(m, params, precision="f32"))
    assert out_f32.shape == (n_edges, output_size), out_f32.shape
    assert jnp.allclose(out_f32, ref, atol=1e-5, rtol=1e-5), "f32 mismatch vs reference"

    # 2) Default fast path: bf16 MXU inputs, f32 accumulate/bias/ReLU.
    #    Packed weights hoisted out of the call (the recommended usage).
    packed = pack_params(params, group=_default_group(), precision="bf16")
    out_bf16 = jax.block_until_ready(relational_model(m, params, packed=packed))
    err = float(jnp.max(jnp.abs(out_bf16 - ref)))
    assert out_bf16.shape == (n_edges, output_size)
    assert err < 5e-2, f"bf16 mismatch vs reference: max abs err {err}"

    # 3) Ragged row count (rows % g != 0) exercises the leftover-tail path.
    m2 = jax.random.normal(jax.random.PRNGKey(1), (133, input_size), jnp.float32)
    out2 = jax.block_until_ready(relational_model(m2, params, packed=packed))
    err2 = float(jnp.max(jnp.abs(out2 - _reference(m2, params))))
    assert out2.shape == (133, output_size)
    assert err2 < 5e-2, f"bf16 ragged mismatch vs reference: max abs err {err2}"

    print("KERNEL_OK")
</pallas_src>

<mosaic_0001>
module attributes {stable_mosaic.version = 11 : i64} {
  func.func @_relational_mlp_kernel(%arg0: i32, %arg1: memref<25x48xf32, #tpu.memory_space<vmem>>, %arg2: memref<48x256xf32, #tpu.memory_space<vmem>>, %arg3: memref<1x256xf32, #tpu.memory_space<vmem>>, %arg4: memref<256x256xf32, #tpu.memory_space<vmem>>, %arg5: memref<1x256xf32, #tpu.memory_space<vmem>>, %arg6: memref<256x32xf32, #tpu.memory_space<vmem>>, %arg7: memref<1x32xf32, #tpu.memory_space<vmem>>, %arg8: memref<25x32xf32, #tpu.memory_space<vmem>>) attributes {dimension_semantics = [#tpu.dimension_semantics<parallel>], iteration_bounds = array<i64: 1>, scalar_prefetch = 0 : i64, scratch_operands = 0 : i64, tpu.core_type = #tpu.core_type<tc>, window_params = [{transform_indices = @transform_0, window_bounds = array<i64: 25, 48>}, {pipeline_mode = #tpu.pipeline_mode<synchronous>, transform_indices = @transform_1, window_bounds = array<i64: 48, 256>}, {pipeline_mode = #tpu.pipeline_mode<synchronous>, transform_indices = @transform_2, window_bounds = array<i64: 1, 256>}, {pipeline_mode = #tpu.pipeline_mode<synchronous>, transform_indices = @transform_3, window_bounds = array<i64: 256, 256>}, {pipeline_mode = #tpu.pipeline_mode<synchronous>, transform_indices = @transform_4, window_bounds = array<i64: 1, 256>}, {pipeline_mode = #tpu.pipeline_mode<synchronous>, transform_indices = @transform_5, window_bounds = array<i64: 256, 32>}, {pipeline_mode = #tpu.pipeline_mode<synchronous>, transform_indices = @transform_6, window_bounds = array<i64: 1, 32>}, {transform_indices = @transform_7, window_bounds = array<i64: 25, 32>}]} {
    %c0 = arith.constant 0 : index
    %c0_0 = arith.constant 0 : index
    %0 = vector.load %arg1[%c0, %c0_0] : memref<25x48xf32, #tpu.memory_space<vmem>>, vector<25x48xf32>
    %c0_1 = arith.constant 0 : index
    %c0_2 = arith.constant 0 : index
    %1 = vector.load %arg2[%c0_1, %c0_2] : memref<48x256xf32, #tpu.memory_space<vmem>>, vector<48x256xf32>
    %cst = arith.constant dense<0.000000e+00> : vector<25x256xf32>
    %2 = tpu.matmul %0, %1, %cst {dimension_numbers = #tpu.dot_dimension_numbers<[1], [0], [0], [1], [0, 0, 1, 1], [], []>} : vector<25x48xf32>, vector<48x256xf32>, vector<25x256xf32> -> vector<25x256xf32>
    %c0_3 = arith.constant 0 : index
    %c0_4 = arith.constant 0 : index
    %3 = vector.load %arg3[%c0_3, %c0_4] : memref<1x256xf32, #tpu.memory_space<vmem>>, vector<1x256xf32>
    %4 = vector.broadcast %3 : vector<1x256xf32> to vector<25x256xf32>
    %5 = arith.addf %2, %4 : vector<25x256xf32>
    %cst_5 = arith.constant 0.000000e+00 : f32
    %6 = vector.broadcast %cst_5 : f32 to vector<25x256xf32>
    %7 = arith.maximumf %5, %6 : vector<25x256xf32>
    %c0_6 = arith.constant 0 : index
    %c0_7 = arith.constant 0 : index
    %8 = vector.load %arg4[%c0_6, %c0_7] : memref<256x256xf32, #tpu.memory_space<vmem>>, vector<256x256xf32>
    %cst_8 = arith.constant dense<0.000000e+00> : vector<25x256xf32>
    %9 = tpu.matmul %7, %8, %cst_8 {dimension_numbers = #tpu.dot_dimension_numbers<[1], [0], [0], [1], [0, 0, 1, 1], [], []>} : vector<25x256xf32>, vector<256x256xf32>, vector<25x256xf32> -> vector<25x256xf32>
    %c0_9 = arith.constant 0 : index
    %c0_10 = arith.constant 0 : index
    %10 = vector.load %arg5[%c0_9, %c0_10] : memref<1x256xf32, #tpu.memory_space<vmem>>, vector<1x256xf32>
    %11 = vector.broadcast %10 : vector<1x256xf32> to vector<25x256xf32>
    %12 = arith.addf %9, %11 : vector<25x256xf32>
    %cst_11 = arith.constant 0.000000e+00 : f32
    %13 = vector.broadcast %cst_11 : f32 to vector<25x256xf32>
    %14 = arith.maximumf %12, %13 : vector<25x256xf32>
    %c0_12 = arith.constant 0 : index
    %c0_13 = arith.constant 0 : index
    %15 = vector.load %arg6[%c0_12, %c0_13] : memref<256x32xf32, #tpu.memory_space<vmem>>, vector<256x32xf32>
    %cst_14 = arith.constant dense<0.000000e+00> : vector<25x32xf32>
    %16 = tpu.matmul %14, %15, %cst_14 {dimension_numbers = #tpu.dot_dimension_numbers<[1], [0], [0], [1], [0, 0, 1, 1], [], []>} : vector<25x256xf32>, vector<256x32xf32>, vector<25x32xf32> -> vector<25x32xf32>
    %c0_15 = arith.constant 0 : index
    %c0_16 = arith.constant 0 : index
    %17 = vector.load %arg7[%c0_15, %c0_16] : memref<1x32xf32, #tpu.memory_space<vmem>>, vector<1x32xf32>
    %18 = vector.broadcast %17 : vector<1x32xf32> to vector<25x32xf32>
    %19 = arith.addf %16, %18 : vector<25x32xf32>
    %c0_17 = arith.constant 0 : index
    %c0_18 = arith.constant 0 : index
    %20 = vector.load %arg8[%c0_17, %c0_18] : memref<25x32xf32, #tpu.memory_space<vmem>>, vector<25x32xf32>
    tpu.vector_store %arg8[%c0_17, %c0_18], %19 {strides = array<i32>} : memref<25x32xf32, #tpu.memory_space<vmem>>, vector<25x32xf32>,
    return
  }
  func.func @transform_0(%arg0: i32) -> (i32, i32) {
    %c0_i32 = arith.constant 0 : i32
    %c0_i32_0 = arith.constant 0 : i32
    return %arg0, %c0_i32 : i32, i32
  }
  func.func @transform_1(%arg0: i32) -> (i32, i32) {
    %c0_i32 = arith.constant 0 : i32
    %c0_i32_0 = arith.constant 0 : i32
    %c0_i32_1 = arith.constant 0 : i32
    return %c0_i32, %c0_i32_0 : i32, i32
  }
  func.func @transform_2(%arg0: i32) -> (i32, i32) {
    %c0_i32 = arith.constant 0 : i32
    %c0_i32_0 = arith.constant 0 : i32
    %c0_i32_1 = arith.constant 0 : i32
    return %c0_i32, %c0_i32_0 : i32, i32
  }
  func.func @transform_3(%arg0: i32) -> (i32, i32) {
    %c0_i32 = arith.constant 0 : i32
    %c0_i32_0 = arith.constant 0 : i32
    %c0_i32_1 = arith.constant 0 : i32
    return %c0_i32, %c0_i32_0 : i32, i32
  }
  func.func @transform_4(%arg0: i32) -> (i32, i32) {
    %c0_i32 = arith.constant 0 : i32
    %c0_i32_0 = arith.constant 0 : i32
    %c0_i32_1 = arith.constant 0 : i32
    return %c0_i32, %c0_i32_0 : i32, i32
  }
  func.func @transform_5(%arg0: i32) -> (i32, i32) {
    %c0_i32 = arith.constant 0 : i32
    %c0_i32_0 = arith.constant 0 : i32
    %c0_i32_1 = arith.constant 0 : i32
    return %c0_i32, %c0_i32_0 : i32, i32
  }
  func.func @transform_6(%arg0: i32) -> (i32, i32) {
    %c0_i32 = arith.constant 0 : i32
    %c0_i32_0 = arith.constant 0 : i32
    %c0_i32_1 = arith.constant 0 : i32
    return %c0_i32, %c0_i32_0 : i32, i32
  }
  func.func @transform_7(%arg0: i32) -> (i32, i32) {
    %c0_i32 = arith.constant 0 : i32
    %c0_i32_0 = arith.constant 0 : i32
    return %arg0, %c0_i32 : i32, i32
  }
}

</mosaic_0001>

<bundles_post_ra>
// kernel: _relational_model_packed.1
= control target key start
LH: loop header
LB: loop body
LE: loop exit
PB: predicated region body
PF: predicated region fallthrough
CT: control target
= control target key end

     0   :  { %v521_v3 = vmov 0.0   ;;  %vm54_vm0 = vcmask 392192   ;;  %vm461_vm1 = vcmask 261120   ;;  %vm465_vm2 = vcmask 253952   ;;  %s927_s1 = inlined_call_operand.vmem [shape: f32[48,256], index: 1, kind: input, shape index: {}]   ;;  %s928_s3 = inlined_call_operand.vmem [shape: f32[256,256], index: 3, kind: input, shape index: {}]   ;;  %s929_s0 = inlined_call_operand.vmem [shape: f32[25,48], index: 0, kind: input, shape index: {}]   ;;  %s930_s5 = inlined_call_operand.vmem [shape: f32[256,32], index: 5, kind: input, shape index: {}]   ;;  %s931_s2 = inlined_call_operand.vmem [shape: f32[1,256], index: 2, kind: input, shape index: {}]   ;;  %s932_s4 = inlined_call_operand.vmem [shape: f32[1,256], index: 4, kind: input, shape index: {}]   ;;  %s933_s6 = inlined_call_operand.vmem [shape: f32[1,32], index: 6, kind: input, shape index: {}]   ;;  %s934_s7 = inlined_call_operand.vmem [shape: f32[25,32], index: 7, kind: output, shape index: {}]  }
   0x1   :  { %v41_v0 = vld [vmem:[%s927_s1 + $0x58] sm:$0xff]  ;;  %v40_v1 = vld [vmem:[%s927_s1 + $0x50] sm:$0xff]  ;;  %v39_v2 = vld [vmem:[%s927_s1 + $0x48] sm:$0xff]  ;;  %131 = vmatprep.mubr.f32.mxu0 %v521_v3 }
   0x2   :  { %87 = vmatprep.subr.mxu0 %v41_v0  ;;  %v38_v4 = vld [vmem:[%s927_s1 + $0x40] sm:$0xff]  ;;  %v37_v5 = vld [vmem:[%s927_s1 + $0x38] sm:$0xff]  ;;  %v36_v6 = vld [vmem:[%s927_s1 + $0x30] sm:$0xff] }
   0x3   :  { %88 = vmatpush1.msra.mxu0 %v40_v1  ;;  %v35_v7 = vld [vmem:[%s927_s1 + $0x28] sm:$0xff]  ;;  %v34_v8 = vld [vmem:[%s927_s1 + $0x20] sm:$0xff]  ;;  %v195_v9 = vld [vmem:[%s928_s3 + $0xf8] sm:$0xff] }
   0x4   :  { %89 = vmatprep.subr.mxu0 %v39_v2  ;;  %v194_v10 = vld [vmem:[%s928_s3 + $0xf0] sm:$0xff]  ;;  %v33_v11 = vld [vmem:[%s927_s1 + $0x18] sm:$0xff]  ;;  %240 = vmatprep.subr.mxu1 %v195_v9  ;;  %v193_v12 = vld [vmem:[%s928_s3 + $0xe8] sm:$0xff] }
   0x5   :  { %90 = vmatpush1.msra.mxu0 %v38_v4  ;;  %v192_v13 = vld [vmem:[%s928_s3 + $0xe0] sm:$0xff]  ;;  %v32_v14 = vld [vmem:[%s927_s1 + $0x10] sm:$0xff]  ;;  %241 = vmatpush1.msra.mxu1 %v194_v10  ;;  %v191_v15 = vld [vmem:[%s928_s3 + $0xd8] sm:$0xff] }
   0x6   :  { %91 = vmatprep.subr.mxu0 %v37_v5  ;;  %v31_v16 = vld [vmem:[%s927_s1 + $0x8] sm:$0xff]  ;;  %242 = vmatprep.subr.mxu1 %v193_v12  ;;  %v190_v17 = vld [vmem:[%s928_s3 + $0xd0] sm:$0xff]  ;;  %v30_v18 = vld [vmem:[%s927_s1] sm:$0xff] }
   0x7   :  { %92 = vmatpush1.msra.mxu0 %v36_v6  ;;  %243 = vmatpush1.msra.mxu1 %v192_v13  ;;  %v189_v19 = vld [vmem:[%s928_s3 + $0xc8] sm:$0xff]  ;;  %v26_v20 = vld [vmem:[%s929_s0] sm:$0xff]  ;;  %v187_v22 = vld [vmem:[%s928_s3 + $0xb8] sm:$0xff] }
   0x8   :  { %93 = vmatprep.subr.mxu0 %v35_v7  ;;  %244 = vmatprep.subr.mxu1 %v191_v15  ;;  %v188_v21 = vld [vmem:[%s928_s3 + $0xc0] sm:$0xff]  ;;  %v186_v23 = vld [vmem:[%s928_s3 + $0xb0] sm:$0xff]  ;;  %v185_v24 = vld [vmem:[%s928_s3 + $0xa8] sm:$0xff] }
   0x9   :  { %94 = vmatpush1.msra.mxu0 %v34_v8  ;;  %245 = vmatpush1.msra.mxu1 %v190_v17  ;;  %v27_v25 = vld [vmem:[%s929_s0 + $0x8] sm:$0xff]  ;;  %v184_v26 = vld [vmem:[%s928_s3 + $0xa0] sm:$0xff]  ;;  %v183_v27 = vld [vmem:[%s928_s3 + $0x98] sm:$0xff] }
   0xa   :  { %95 = vmatprep.subr.mxu0 %v33_v11  ;;  %246 = vmatprep.subr.mxu1 %v189_v19  ;;  %v182_v28 = vld [vmem:[%s928_s3 + $0x90] sm:$0xff]  ;;  %v181_v29 = vld [vmem:[%s928_s3 + $0x88] sm:$0xff]  ;;  %v180_v31 = vld [vmem:[%s928_s3 + $0x80] sm:$0xff] }
   0xb   :  { %96 = vmatpush1.msra.mxu0 %v32_v14  ;;  %247 = vmatpush1.msra.mxu1 %v188_v21  ;;  %v28_v30 = vld [vmem:[%s929_s0 + $0x10] sm:$0xff]  ;;  %v179_v32 = vld [vmem:[%s928_s3 + $0x78] sm:$0xff]  ;;  %v177_v34 = vld [vmem:[%s928_s3 + $0x68] sm:$0xff] }
   0xc   :  { %97 = vmatprep.subr.mxu0 %v31_v16  ;;  %248 = vmatprep.subr.mxu1 %v187_v22  ;;  %v178_v33 = vld [vmem:[%s928_s3 + $0x70] sm:$0xff]  ;;  %v29_v35 = vld [vmem:[%s929_s0 + $0x18] sm:$0x1]  ;;  %v176_v36 = vld [vmem:[%s928_s3 + $0x60] sm:$0xff] }
   0xd   :  { %98 = vmatpush1.msra.mxu0 %v30_v18  ;;  %249 = vmatpush1.msra.mxu1 %v186_v23  ;;  %v175_v37 = vld [vmem:[%s928_s3 + $0x58] sm:$0xff]  ;;  %v174_v38 = vld [vmem:[%s928_s3 + $0x50] sm:$0xff]  ;;  %v173_v39 = vld [vmem:[%s928_s3 + $0x48] sm:$0xff] }
   0xe   :  { %471 = vmatmul.mubr.msk.f32.vlgmr.msra.gmra.mxu0 %vm54_vm0, %v26_v20  ;;  %250 = vmatprep.subr.mxu1 %v185_v24  ;;  %v172_v40 = vld [vmem:[%s928_s3 + $0x40] sm:$0xff]  ;;  %v171_v41 = vld [vmem:[%s928_s3 + $0x38] sm:$0xff]  ;;  %v170_v42 = vld [vmem:[%s928_s3 + $0x30] sm:$0xff] }
   0xf   :  { %137 = vmatprep.mubr.f32.mxu0 %v521_v3  ;;  %251 = vmatpush1.msra.mxu1 %v184_v26  ;;  %v169_v43 = vld [vmem:[%s928_s3 + $0x28] sm:$0xff]  ;;  %v168_v44 = vld [vmem:[%s928_s3 + $0x20] sm:$0xff]  ;;  %v167_v45 = vld [vmem:[%s928_s3 + $0x18] sm:$0xff] }
  0x10   :  { %252 = vmatprep.subr.mxu1 %v183_v27  ;;  %v166_v46 = vld [vmem:[%s928_s3 + $0x10] sm:$0xff]  ;;  %v165_v47 = vld [vmem:[%s928_s3 + $0x8] sm:$0xff]  ;;  %v164_v48 = vld [vmem:[%s928_s3] sm:$0xff] }
  0x11   :  { %253 = vmatpush1.msra.mxu1 %v182_v28  ;;  %v227_v49 = vld [vmem:[%s928_s3 + $0x1f8] sm:$0xff]  ;;  %v226_v50 = vld [vmem:[%s928_s3 + $0x1f0] sm:$0xff]  ;;  %v225_v51 = vld [vmem:[%s928_s3 + $0x1e8] sm:$0xff] }
  0x12   :  { %472 = vmatmul.mubr.msk.f32.gmra.mxu0 %vm54_vm0, %v27_v25  ;;  %254 = vmatprep.subr.mxu1 %v181_v29  ;;  %v224_v52 = vld [vmem:[%s928_s3 + $0x1e0] sm:$0xff]  ;;  %v223_v53 = vld [vmem:[%s928_s3 + $0x1d8] sm:$0xff]  ;;  %v222_v54 = vld [vmem:[%s928_s3 + $0x1d0] sm:$0xff] }
  0x13   :  { %143 = vmatprep.mubr.f32.mxu0 %v521_v3  ;;  %255 = vmatpush1.msra.mxu1 %v180_v31  ;;  %v221_v55 = vld [vmem:[%s928_s3 + $0x1c8] sm:$0xff]  ;;  %v220_v56 = vld [vmem:[%s928_s3 + $0x1c0] sm:$0xff]  ;;  %v219_v57 = vld [vmem:[%s928_s3 + $0x1b8] sm:$0xff] }
  0x14   :  { %256 = vmatprep.subr.mxu1 %v179_v32  ;;  %v218_v58 = vld [vmem:[%s928_s3 + $0x1b0] sm:$0xff]  ;;  %v217_v59 = vld [vmem:[%s928_s3 + $0x1a8] sm:$0xff]  ;;  %v216_v60 = vld [vmem:[%s928_s3 + $0x1a0] sm:$0xff] }
  0x15   :  { %257 = vmatpush1.msra.mxu1 %v178_v33  ;;  %v215_v61 = vld [vmem:[%s928_s3 + $0x198] sm:$0xff]  ;;  %v214_v62 = vld [vmem:[%s928_s3 + $0x190] sm:$0xff]  ;;  %v213_v63 = vld [vmem:[%s928_s3 + $0x188] sm:$0xff] }
  0x16   :  { %473 = vmatmul.mubr.msk.f32.gmra.mxu0 %vm54_vm0, %v28_v30  ;;  %258 = vmatprep.subr.mxu1 %v177_v34  ;;  %v212_v0 = vld [vmem:[%s928_s3 + $0x180] sm:$0xff]  ;;  %v211_v1 = vld [vmem:[%s928_s3 + $0x178] sm:$0xff]  ;;  %v210_v2 = vld [vmem:[%s928_s3 + $0x170] sm:$0xff] }
  0x17   :  { %149 = vmatprep.mubr.f32.mxu0 %v521_v3  ;;  %259 = vmatpush1.msra.mxu1 %v176_v36  ;;  %v209_v3 = vld [vmem:[%s928_s3 + $0x168] sm:$0xff]  ;;  %v208_v4 = vld [vmem:[%s928_s3 + $0x160] sm:$0xff]  ;;  %v207_v5 = vld [vmem:[%s928_s3 + $0x158] sm:$0xff] }
  0x18   :  { %260 = vmatprep.subr.mxu1 %v175_v37  ;;  %v206_v6 = vld [vmem:[%s928_s3 + $0x150] sm:$0xff]  ;;  %v205_v7 = vld [vmem:[%s928_s3 + $0x148] sm:$0xff]  ;;  %v204_v8 = vld [vmem:[%s928_s3 + $0x140] sm:$0xff] }
  0x19   :  { %261 = vmatpush1.msra.mxu1 %v174_v38  ;;  %v203_v9 = vld [vmem:[%s928_s3 + $0x138] sm:$0xff]  ;;  %v202_v10 = vld [vmem:[%s928_s3 + $0x130] sm:$0xff]  ;;  %v201_v11 = vld [vmem:[%s928_s3 + $0x128] sm:$0xff] }
  0x1a   :  { %474 = vmatmul.mubr.msk.f32.gmra.mxu0 %vm54_vm0, %v29_v35  ;;  %262 = vmatprep.subr.mxu1 %v173_v39  ;;  %v200_v12 = vld [vmem:[%s928_s3 + $0x120] sm:$0xff]  ;;  %v199_v13 = vld [vmem:[%s928_s3 + $0x118] sm:$0xff]  ;;  %v198_v14 = vld [vmem:[%s928_s3 + $0x110] sm:$0xff] }
  0x1b   :  { %263 = vmatpush1.msra.mxu1 %v172_v40  ;;  %v197_v15 = vld [vmem:[%s928_s3 + $0x108] sm:$0xff]  ;;  %v196_v16 = vld [vmem:[%s928_s3 + $0x100] sm:$0xff]  ;;  %v368_v17 = vld [vmem:[%s930_s5 + $0xf8] sm:$0xff] }
  0x1c   :  { %264 = vmatprep.subr.mxu1 %v171_v41  ;;  %v352_v18 = vld [vmem:[%s930_s5 + $0x78] sm:$0xff]  ;;  %v367_v19 = vld [vmem:[%s930_s5 + $0xf0] sm:$0xff]  ;;  %476 = vmatprep.subr.mxu0 %v368_v17  ;;  %v366_v21 = vld [vmem:[%s930_s5 + $0xe8] sm:$0xff]  ;;  %v44_v41 = vlaneseq }
  0x1d   :  { %265 = vmatpush1.msra.mxu1 %v170_v42  ;;  %v351_v20 = vld [vmem:[%s930_s5 + $0x70] sm:$0xff]  ;;  %477 = vmatpush3.msra.mxu0 %v352_v18  ;;  %v350_v22 = vld [vmem:[%s930_s5 + $0x68] sm:$0xff]  ;;  %v365_v23 = vld [vmem:[%s930_s5 + $0xe0] sm:$0xff] }
  0x1e   :  { %266 = vmatprep.subr.mxu1 %v169_v43  ;;  %478 = vmatprep.subr.mxu0 %v367_v19  ;;  %v349_v24 = vld [vmem:[%s930_s5 + $0x60] sm:$0xff]  ;;  %v364_v25 = vld [vmem:[%s930_s5 + $0xd8] sm:$0xff]  ;;  %v363_v27 = vld [vmem:[%s930_s5 + $0xd0] sm:$0xff]  ;;  %v45_v42 = vshrl.u32 %v44_v41, 7 }
  0x1f   :  { %267 = vmatpush1.msra.mxu1 %v168_v44  ;;  %479 = vmatpush3.msra.mxu0 %v351_v20  ;;  %v348_v26 = vld [vmem:[%s930_s5 + $0x58] sm:$0xff]  ;;  %v347_v28 = vld [vmem:[%s930_s5 + $0x50] sm:$0xff]  ;;  %v362_v29 = vld [vmem:[%s930_s5 + $0xc8] sm:$0xff] }
  0x20   :  { %268 = vmatprep.subr.mxu1 %v167_v45  ;;  %480 = vmatprep.subr.mxu0 %v366_v21  ;;  %v346_v30 = vld [vmem:[%s930_s5 + $0x48] sm:$0xff]  ;;  %v361_v31 = vld [vmem:[%s930_s5 + $0xc0] sm:$0xff]  ;;  %v360_v33 = vld [vmem:[%s930_s5 + $0xb8] sm:$0xff]  ;;  %v46_v43 = vsub.s32 0, %v45_v42  ;;  %v50_v45 = vsub.s32 1, %v45_v42 }
  0x21   :  { %269 = vmatpush1.msra.mxu1 %v166_v46  ;;  %481 = vmatpush3.msra.mxu0 %v350_v22  ;;  %v345_v32 = vld [vmem:[%s930_s5 + $0x40] sm:$0xff]  ;;  %v344_v34 = vld [vmem:[%s930_s5 + $0x38] sm:$0xff]  ;;  %v359_v35 = vld [vmem:[%s930_s5 + $0xb0] sm:$0xff] }
  0x22   :  { %270 = vmatprep.subr.mxu1 %v165_v47  ;;  %482 = vmatprep.subr.mxu0 %v365_v23  ;;  %v343_v36 = vld [vmem:[%s930_s5 + $0x30] sm:$0xff]  ;;  %v358_v37 = vld [vmem:[%s930_s5 + $0xa8] sm:$0xff]  ;;  %v357_v39 = vld [vmem:[%s930_s5 + $0xa0] sm:$0xff] }
  0x23   :  { %271 = vmatpush1.msra.mxu1 %v164_v48  ;;  %483 = vmatpush3.msra.mxu0 %v349_v24  ;;  %v342_v38 = vld [vmem:[%s930_s5 + $0x28] sm:$0xff]  ;;  %v341_v40 = vld [vmem:[%s930_s5 + $0x20] sm:$0xff] }
  0x24   :  { %272 = vmatprep.subr.mxu1 %v227_v49  ;;  %484 = vmatprep.subr.mxu0 %v364_v25  ;;  %v42_v44 = vld [vmem:[%s931_s2] sm:$0x3] }
  0x25   :  { %273 = vmatpush2.msra.mxu1 %v226_v50  ;;  %485 = vmatpush3.msra.mxu0 %v348_v26  ;;  %v47_v46 = vrot.slane %v42_v44, %v46_v43  ;;  %v51_v47 = vrot.slane %v42_v44, %v50_v45  ;;  %v475_v44 = vld [vmem:[%s933_s6] ss:$0 sm:$0xff] }
  0x26   :  { %274 = vmatprep.subr.mxu1 %v225_v51  ;;  %486 = vmatprep.subr.mxu0 %v363_v27 }
  0x27   :  { %275 = vmatpush2.msra.mxu1 %v224_v52  ;;  %487 = vmatpush3.msra.mxu0 %v347_v28 }
  0x28   :  { %276 = vmatprep.subr.mxu1 %v223_v53  ;;  %488 = vmatprep.subr.mxu0 %v362_v29 }
  0x29   :  { %277 = vmatpush2.msra.mxu1 %v222_v54  ;;  %489 = vmatpush3.msra.mxu0 %v346_v30 }
  0x2a   :  { %278 = vmatprep.subr.mxu1 %v221_v55  ;;  %490 = vmatprep.subr.mxu0 %v361_v31 }
  0x2b   :  { %279 = vmatpush2.msra.mxu1 %v220_v56  ;;  %491 = vmatpush3.msra.mxu0 %v345_v32 }
  0x2c   :  { %280 = vmatprep.subr.mxu1 %v219_v57  ;;  %492 = vmatprep.subr.mxu0 %v360_v33 }
  0x2d   :  { %281 = vmatpush2.msra.mxu1 %v218_v58  ;;  %493 = vmatpush3.msra.mxu0 %v344_v34 }
  0x2e   :  { %282 = vmatprep.subr.mxu1 %v217_v59  ;;  %494 = vmatprep.subr.mxu0 %v359_v35 }
  0x2f   :  { %283 = vmatpush2.msra.mxu1 %v216_v60  ;;  %495 = vmatpush3.msra.mxu0 %v343_v36 }
  0x30   :  { %284 = vmatprep.subr.mxu1 %v215_v61  ;;  %496 = vmatprep.subr.mxu0 %v358_v37 }
  0x31   :  { %285 = vmatpush2.msra.mxu1 %v214_v62  ;;  %497 = vmatpush3.msra.mxu0 %v342_v38 }
  0x32   :  { %286 = vmatprep.subr.mxu1 %v213_v63  ;;  %498 = vmatprep.subr.mxu0 %v357_v39 }
  0x33   :  { %287 = vmatpush2.msra.mxu1 %v212_v0  ;;  %499 = vmatpush3.msra.mxu0 %v341_v40 }
  0x34   :  { %288 = vmatprep.subr.mxu1 %v211_v1 }
  0x35   :  { %289 = vmatpush2.msra.mxu1 %v210_v2 }
  0x36   :  { %290 = vmatprep.subr.mxu1 %v209_v3 }
  0x37   :  { %291 = vmatpush2.msra.mxu1 %v208_v4 }
  0x38   :  { %292 = vmatprep.subr.mxu1 %v207_v5 }
  0x39   :  { %293 = vmatpush2.msra.mxu1 %v206_v6 }
  0x3a   :  { %294 = vmatprep.subr.mxu1 %v205_v7 }
  0x3b   :  { %295 = vmatpush2.msra.mxu1 %v204_v8  ;;  %v356_v8 = vld [vmem:[%s930_s5 + $0x98] sm:$0xff] }
  0x3c   :  { %296 = vmatprep.subr.mxu1 %v203_v9  ;;  %500 = vmatprep.subr.mxu0 %v356_v8  ;;  %v340_v9 = vld [vmem:[%s930_s5 + $0x18] sm:$0xff] }
  0x3d   :  { %297 = vmatpush2.msra.mxu1 %v202_v10  ;;  %501 = vmatpush3.msra.mxu0 %v340_v9  ;;  %v355_v10 = vld [vmem:[%s930_s5 + $0x90] sm:$0xff] }
  0x3e   :  { %298 = vmatprep.subr.mxu1 %v201_v11  ;;  %502 = vmatprep.subr.mxu0 %v355_v10  ;;  %v339_v11 = vld [vmem:[%s930_s5 + $0x10] sm:$0xff] }
  0x3f   :  { %299 = vmatpush2.msra.mxu1 %v200_v12  ;;  %503 = vmatpush3.msra.mxu0 %v339_v11  ;;  %v354_v12 = vld [vmem:[%s930_s5 + $0x88] sm:$0xff] }
  0x40   :  { %300 = vmatprep.subr.mxu1 %v199_v13  ;;  %504 = vmatprep.subr.mxu0 %v354_v12  ;;  %v338_v13 = vld [vmem:[%s930_s5 + $0x8] sm:$0xff] }
  0x41   :  { %301 = vmatpush2.msra.mxu1 %v198_v14  ;;  %505 = vmatpush3.msra.mxu0 %v338_v13  ;;  %v353_v14 = vld [vmem:[%s930_s5 + $0x80] sm:$0xff] }
  0x42   :  { %302 = vmatprep.subr.mxu1 %v197_v15  ;;  %506 = vmatprep.subr.mxu0 %v353_v14  ;;  %v337_v15 = vld [vmem:[%s930_s5] sm:$0xff] }
  0x43   :  { %303 = vmatpush2.msra.mxu1 %v196_v16  ;;  %507 = vmatpush3.msra.mxu0 %v337_v15  ;;  %v228_v16 = vld [vmem:[%s932_s4] sm:$0x3] }
  0x44   :  { %v233_v17 = vrot.slane %v228_v16, %v46_v43  ;;  %v237_v18 = vrot.slane %v228_v16, %v50_v45 }
  0xce   :  { %v133_v48 = vpop.f32.mrf.mxu0 }
  0xcf   :  { %v134_v49 = vadd.f32 %v133_v48, %v47_v46 }
  0xd0   :  { %v135_v50 = vpop.f32.mrf.mxu0 }
  0xd1   :  { %v136_v51 = vadd.f32 %v135_v50, %v51_v47  ;;  %v156_v54 = vmax.f32 %v134_v49, 0.0 }
  0xd2   :  { %v139_v52 = vpop.f32.mrf.mxu0 }
  0xd3   :  { %v157_v53 = vmax.f32 %v136_v51, 0.0  ;;  %v140_v55 = vadd.f32 %v139_v52, %v47_v46 }
  0xd4   :  { %v141_v56 = vpop.f32.mrf.mxu0 }
  0xd5   :  { %v142_v57 = vadd.f32 %v141_v56, %v51_v47  ;;  %304 = vmatprep.mubr.f32.mxu1 %v157_v53  ;;  %v158_v60 = vmax.f32 %v140_v55, 0.0 }
  0xd6   :  { %v145_v58 = vpop.f32.mrf.mxu0  ;;  %305 = vmatmul.mubr.f32.vlgmr.msra.gmra.mxu1 %v156_v54 }
  0xd7   :  { %v159_v59 = vmax.f32 %v142_v57, 0.0  ;;  %v146_v61 = vadd.f32 %v145_v58, %v47_v46 }
  0xd8   :  { %v147_v62 = vpop.f32.mrf.mxu0 }
  0xd9   :  { %v148_v63 = vadd.f32 %v147_v62, %v51_v47  ;;  %310 = vmatprep.mubr.f32.mxu1 %v159_v59  ;;  %v160_v2 = vmax.f32 %v146_v61, 0.0 }
  0xda   :  { %v151_v0 = vpop.f32.mrf.mxu0  ;;  %311 = vmatmul.mubr.f32.gmra.mxu1 %v158_v60 }
  0xdb   :  { %v161_v1 = vmax.f32 %v148_v63, 0.0  ;;  %v152_v3 = vadd.f32 %v151_v0, %v47_v46 }
  0xdc   :  { %v153_v4 = vpop.f32.mrf.mxu0 }
  0xdd   :  { %v154_v5 = vadd.f32 %v153_v4, %v51_v47  ;;  %316 = vmatprep.mubr.f32.mxu1 %v161_v1  ;;  %v162_v7 = vmax.f32 %v152_v3, 0.0 }
  0xde   :  { %317 = vmatmul.mubr.f32.gmra.mxu1 %v160_v2 }
  0xdf   :  { %v163_v6 = vmax.f32 %v154_v5, 0.0 }
  0xe1   :  { %322 = vmatprep.mubr.f32.mxu1 %v163_v6 }
  0xe2   :  { %323 = vmatmul.mubr.f32.gmra.mxu1 %v162_v7 }
 0x196   :  { %v306_v19 = vpop.f32.mrf.mxu1 }
 0x197   :  { %v307_v20 = vadd.f32 %v306_v19, %v233_v17 }
 0x198   :  { %v308_v21 = vpop.f32.mrf.mxu1 }
 0x199   :  { %v309_v22 = vadd.f32 %v308_v21, %v237_v18  ;;  %v329_v25 = vmax.f32 %v307_v20, 0.0 }
 0x19a   :  { %v312_v23 = vpop.f32.mrf.mxu1 }
 0x19b   :  { %v330_v24 = vmax.f32 %v309_v22, 0.0  ;;  %v313_v26 = vadd.f32 %v312_v23, %v233_v17 }
 0x19c   :  { %v314_v27 = vpop.f32.mrf.mxu1 }
 0x19d   :  { %v315_v28 = vadd.f32 %v314_v27, %v237_v18  ;;  %440 = vmatprep.mubr.f32.mxu0 %v330_v24  ;;  %v331_v31 = vmax.f32 %v313_v26, 0.0 }
 0x19e   :  { %v318_v29 = vpop.f32.mrf.mxu1  ;;  %441 = vmatmul.mubr.f32.vlgmr.msra.gmra.mxu0 %v329_v25 }
 0x19f   :  { %v332_v30 = vmax.f32 %v315_v28, 0.0  ;;  %v319_v32 = vadd.f32 %v318_v29, %v233_v17 }
 0x1a0   :  { %v320_v33 = vpop.f32.mrf.mxu1 }
 0x1a1   :  { %v321_v34 = vadd.f32 %v320_v33, %v237_v18  ;;  %445 = vmatprep.mubr.f32.mxu0 %v332_v30  ;;  %v333_v37 = vmax.f32 %v319_v32, 0.0 }
 0x1a2   :  { %v324_v35 = vpop.f32.mrf.mxu1  ;;  %446 = vmatmul.mubr.f32.gmra.mxu0 %v331_v31 }
 0x1a3   :  { %v334_v36 = vmax.f32 %v321_v34, 0.0  ;;  %v325_v38 = vadd.f32 %v324_v35, %v233_v17 }
 0x1a4   :  { %v326_v39 = vpop.f32.mrf.mxu1 }
 0x1a5   :  { %v327_v40 = vadd.f32 %v326_v39, %v237_v18  ;;  %450 = vmatprep.mubr.f32.mxu0 %v334_v36  ;;  %v335_v42 = vmax.f32 %v325_v38, 0.0 }
 0x1a6   :  { %451 = vmatmul.mubr.f32.gmra.mxu0 %v333_v37 }
 0x1a7   :  { %v336_v41 = vmax.f32 %v327_v40, 0.0 }
 0x1a9   :  { %455 = vmatprep.mubr.f32.mxu0 %v336_v41 }
 0x1aa   :  { %456 = vmatmul.mubr.f32.gmra.mxu0 %v335_v42 }
 0x25e   :  { %v508_v43 = vpop.f32.mrf.mxu0 }
 0x260   :  { %v509_v45 = vpop.f32.mrf.mxu0 }
 0x261   :  { %v510_v46 = vadd.f32 %v509_v45, %v508_v43 }
 0x262   :  { %v511_v47 = vpop.f32.mrf.mxu0 }
 0x263   :  { %v443_v48 = vadd.f32 %v510_v46, %v475_v44 }
 0x264   :  { %v512_v49 = vpop.f32.mrf.mxu0 }
 0x265   :  { %462 = vst.msk [vmem:[%s934_s7] sm:$0xff] %vm461_vm1, %v443_v48  ;;  %v513_v50 = vadd.f32 %v512_v49, %v511_v47 }
 0x266   :  { %v514_v51 = vpop.f32.mrf.mxu0 }
 0x267   :  { %v448_v52 = vadd.f32 %v513_v50, %v475_v44 }
 0x268   :  { %v515_v53 = vpop.f32.mrf.mxu0 }
 0x269   :  { %463 = vst.msk [vmem:[%s934_s7 + $0x8] sm:$0xff] %vm461_vm1, %v448_v52  ;;  %v516_v54 = vadd.f32 %v515_v53, %v514_v51 }
 0x26a   :  { %v517_v55 = vpop.f32.mrf.mxu0 }
 0x26b   :  { %v453_v56 = vadd.f32 %v516_v54, %v475_v44 }
 0x26c   :  { %v518_v57 = vpop.f32.mrf.mxu0 }
 0x26d   :  { %464 = vst.msk [vmem:[%s934_s7 + $0x10] sm:$0xff] %vm461_vm1, %v453_v56  ;;  %v519_v58 = vadd.f32 %v518_v57, %v517_v55 }
 0x26f   :  { %v458_v59 = vadd.f32 %v519_v58, %v475_v44 }
 0x271   :  { %466 = vst.msk [vmem:[%s934_s7 + $0x18] sm:$0x1] %vm465_vm2, %v458_v59 }

</bundles_post_ra>
